<compile_context>
chip_gen: v7x
topology: tpu7x:2x2x1
jax: 0.10.0
libtpu: 0.0.40
codegen_flags: <defaults>
</compile_context>

<pallas_src>
import functools

import jax
import jax.numpy as jnp
from jax.experimental import pallas as pl
from jax.experimental.pallas import tpu as pltpu


def _round_up(x, m):
    return ((x + m - 1) // m) * m


def _avg_pool_kernel(pw_ref, x_ref, o_ref, *, k, s, p, H, OH, OW):
    # pw_ref : (W, OW)      column-pooling weights (1/k^2 folded in), x.dtype
    # x_ref  : (TB, H, W)   tile of images (batch dims flattened to B)
    # o_ref  : (TB, OH*OW)  pooled outputs, spatial dims flattened (lane-dense)
    x = x_ref[...]
    tb = x.shape[0]
    W = x.shape[2]

    # ---- stage 1 (MXU): contract W  ->  y1[b, h, ow] -----------------------
    x2 = x.reshape(tb * H, W)                       # merge leading dims (layout-trivial)
    y2 = jnp.dot(x2, pw_ref[...], preferred_element_type=jnp.float32)   # (TB*H, OW)
    y1 = y2.reshape(tb, H, OW)                      # split leading dim back

    # ---- stage 2 (VPU): windowed sums over H, statically unrolled ----------
    slabs = []
    for oh in range(OH):
        h0 = oh * s - p
        rows = [h for h in range(h0, h0 + k) if 0 <= h < H]
        if rows:
            acc = y1[:, rows[0], :]
            for h in rows[1:]:
                acc = acc + y1[:, h, :]
        else:  # window lies entirely in the zero padding (only if p >= k)
            acc = jnp.zeros((tb, OW), jnp.float32)
        slabs.append(acc)

    out = jnp.concatenate(slabs, axis=-1)           # (TB, OH*OW)
    o_ref[...] = out.astype(o_ref.dtype)


def avg_pool2d(x, kernel_size, stride=None, padding=0, dilation=1):
    if dilation != 1:
        raise NotImplementedError  # matches the reference module
    k = int(kernel_size)
    s = int(k if stride is None else stride)
    p = int(padding)

    N, C, D, H, W = x.shape
    OH = (H + 2 * p - k) // s + 1
    OW = (W + 2 * p - k) // s + 1
    assert OH > 0 and OW > 0, "pooling window larger than (padded) input"

    B = N * C * D
    OHOW = OH * OW
    dtype = x.dtype
    itemsize = jnp.dtype(dtype).itemsize
    lane = 128

    # Column pooling matrix Pw^T (W, OW): entry 1/k^2 where the (clipped)
    # window covers that column.  Zero padding is folded in; divisor stays
    # k*k (count_include_pad=True, matching the PyTorch unfold().mean()).
    starts = jnp.arange(OW, dtype=jnp.int32)[:, None] * s - p
    cols = jnp.arange(W, dtype=jnp.int32)[None, :]
    pw = ((cols >= starts) & (cols < starts + k)).astype(jnp.float32) / float(k * k)
    pw = pw.T.astype(dtype)                          # (W, OW), same dtype as x

    x3 = x.reshape(B, H, W)                          # free contiguous reshape

    # ---- tile-size selection: dtype-aware, VMEM-accounted, >= 4 grid steps --
    sub = max(8, 32 // itemsize)                     # 8 f32, 16 bf16, 32 int8
    x_img = _round_up(H, 8) * _round_up(W, lane) * itemsize        # per-image x block
    y1_img = _round_up(H, 8) * _round_up(OW, lane) * 4             # f32 intermediate
    out_img = _round_up(OHOW, lane) * itemsize                     # out block row
    acc_img = _round_up(OHOW, lane) * 4                            # f32 result row
    per_img = 2 * x_img + y1_img + 2 * out_img + acc_img           # 2x = double buffer
    budget = 16 << 20                                # conservative tile budget
    tb = max(sub, budget // max(per_img, 1))
    if B > sub:                                      # keep >= ~4 grid steps when possible
        tb = min(tb, _round_up(pl.cdiv(B, 4), sub))  # (2 TCs on v7x + DMA overlap)
    tb = min(tb, _round_up(B, sub))
    tb = max(sub, (tb // sub) * sub)
    grid = pl.cdiv(B, tb)                            # partial last block handled by Pallas

    w_bytes = 2 * _round_up(W, 8) * _round_up(OW, lane) * itemsize  # double-buffered
    total_bytes = w_bytes + tb * per_img
    vmem_limit = int(min(48 << 20, max(24 << 20, 2 * total_bytes)))

    cost = pl.CostEstimate(
        flops=int(2 * B * H * W * OW + B * OHOW * k),
        transcendentals=0,
        bytes_accessed=int(B * (H * W + OHOW) * itemsize + W * OW * itemsize),
    )

    kernel = functools.partial(_avg_pool_kernel, k=k, s=s, p=p, H=H, OH=OH, OW=OW)

    out = pl.pallas_call(
        kernel,
        out_shape=jax.ShapeDtypeStruct((B, OHOW), dtype),
        grid=(grid,),
        in_specs=[
            pl.BlockSpec((W, OW), lambda i: (0, 0)),        # tiny weights, VMEM-resident
            pl.BlockSpec((tb, H, W), lambda i: (i, 0, 0)),  # streaming image tile
        ],
        out_specs=pl.BlockSpec((tb, OHOW), lambda i: (i, 0)),
        compiler_params=pltpu.CompilerParams(
            dimension_semantics=("parallel",),
            vmem_limit_bytes=vmem_limit,
        ),
        cost_estimate=cost,
    )(pw, x3)

    return out.reshape(N, C, D, OH, OW)


def avg_pool2d_ref(x, kernel_size, stride=None, padding=0):
    # Pure-JAX reference matching the PyTorch forward exactly
    # (zeros from padding are included in the mean; divisor is k*k).
    k = kernel_size
    s = k if stride is None else stride
    p = padding
    xp = jnp.pad(x, ((0, 0), (0, 0), (0, 0), (p, p), (p, p)))
    summed = jax.lax.reduce_window(
        xp, 0.0, jax.lax.add,
        window_dimensions=(1, 1, 1, k, k),
        window_strides=(1, 1, 1, s, s),
        padding="VALID")
    return summed / float(k * k)


if __name__ == "__main__":
    key = jax.random.PRNGKey(0)
    # Small 5-D input consistent with the module's forward: [N, C, D, H, W]
    x = jax.random.normal(key, (2, 3, 4, 16, 16), dtype=jnp.float32)

    # Config 1: kernel 3, stride 2, padding 1
    y = avg_pool2d(x, 3, stride=2, padding=1)
    y = jax.block_until_ready(y)
    y_ref = avg_pool2d_ref(x, 3, stride=2, padding=1)
    assert y.shape == y_ref.shape, (y.shape, y_ref.shape)
    assert jnp.allclose(y, y_ref, atol=1e-5, rtol=1e-5), "mismatch vs reference (cfg 1)"

    # Config 2: default stride (= kernel size), no padding
    y2 = avg_pool2d(x, 2)
    y2 = jax.block_until_ready(y2)
    y2_ref = avg_pool2d_ref(x, 2)
    assert y2.shape == y2_ref.shape, (y2.shape, y2_ref.shape)
    assert jnp.allclose(y2, y2_ref, atol=1e-5, rtol=1e-5), "mismatch vs reference (cfg 2)"

    print("KERNEL_OK")
</pallas_src>

<mosaic_0001>
module attributes {stable_mosaic.version = 11 : i64} {
  func.func @_avg_pool_kernel(%arg0: i32, %arg1: memref<16x8xf32, #tpu.memory_space<vmem>>, %arg2: memref<8x16x16xf32, #tpu.memory_space<vmem>>, %arg3: memref<8x64xf32, #tpu.memory_space<vmem>>) attributes {dimension_semantics = [#tpu.dimension_semantics<parallel>], iteration_bounds = array<i64: 3>, scalar_prefetch = 0 : i64, scratch_operands = 0 : i64, tpu.core_type = #tpu.core_type<tc>, window_params = [{pipeline_mode = #tpu.pipeline_mode<synchronous>, transform_indices = @transform_0, window_bounds = array<i64: 16, 8>}, {transform_indices = @transform_1, window_bounds = array<i64: 8, 16, 16>}, {transform_indices = @transform_2, window_bounds = array<i64: 8, 64>}]} {
    %c0 = arith.constant 0 : index
    %c0_0 = arith.constant 0 : index
    %c0_1 = arith.constant 0 : index
    %0 = vector.load %arg2[%c0, %c0_0, %c0_1] : memref<8x16x16xf32, #tpu.memory_space<vmem>>, vector<8x16x16xf32>
    %1 = vector.shape_cast %0 : vector<8x16x16xf32> to vector<128x16xf32>
    %c0_2 = arith.constant 0 : index
    %c0_3 = arith.constant 0 : index
    %2 = vector.load %arg1[%c0_2, %c0_3] : memref<16x8xf32, #tpu.memory_space<vmem>>, vector<16x8xf32>
    %cst = arith.constant dense<0.000000e+00> : vector<128x8xf32>
    %3 = tpu.matmul %1, %2, %cst {dimension_numbers = #tpu.dot_dimension_numbers<[1], [0], [0], [1], [0, 0, 1, 1], [], []>} : vector<128x16xf32>, vector<16x8xf32>, vector<128x8xf32> -> vector<128x8xf32>
    %4 = vector.shape_cast %3 : vector<128x8xf32> to vector<8x16x8xf32>
    %5 = vector.extract_strided_slice %4 {offsets = [0, 0, 0], sizes = [8, 1, 8], strides = [1, 1, 1]} : vector<8x16x8xf32> to vector<8x1x8xf32>
    %6 = vector.shape_cast %5 : vector<8x1x8xf32> to vector<8x8xf32>
    %7 = vector.extract_strided_slice %4 {offsets = [0, 1, 0], sizes = [8, 1, 8], strides = [1, 1, 1]} : vector<8x16x8xf32> to vector<8x1x8xf32>
    %8 = vector.shape_cast %7 : vector<8x1x8xf32> to vector<8x8xf32>
    %9 = arith.addf %6, %8 : vector<8x8xf32>
    %10 = vector.extract_strided_slice %4 {offsets = [0, 1, 0], sizes = [8, 1, 8], strides = [1, 1, 1]} : vector<8x16x8xf32> to vector<8x1x8xf32>
    %11 = vector.shape_cast %10 : vector<8x1x8xf32> to vector<8x8xf32>
    %12 = vector.extract_strided_slice %4 {offsets = [0, 2, 0], sizes = [8, 1, 8], strides = [1, 1, 1]} : vector<8x16x8xf32> to vector<8x1x8xf32>
    %13 = vector.shape_cast %12 : vector<8x1x8xf32> to vector<8x8xf32>
    %14 = arith.addf %11, %13 : vector<8x8xf32>
    %15 = vector.extract_strided_slice %4 {offsets = [0, 3, 0], sizes = [8, 1, 8], strides = [1, 1, 1]} : vector<8x16x8xf32> to vector<8x1x8xf32>
    %16 = vector.shape_cast %15 : vector<8x1x8xf32> to vector<8x8xf32>
    %17 = arith.addf %14, %16 : vector<8x8xf32>
    %18 = vector.extract_strided_slice %4 {offsets = [0, 3, 0], sizes = [8, 1, 8], strides = [1, 1, 1]} : vector<8x16x8xf32> to vector<8x1x8xf32>
    %19 = vector.shape_cast %18 : vector<8x1x8xf32> to vector<8x8xf32>
    %20 = vector.extract_strided_slice %4 {offsets = [0, 4, 0], sizes = [8, 1, 8], strides = [1, 1, 1]} : vector<8x16x8xf32> to vector<8x1x8xf32>
    %21 = vector.shape_cast %20 : vector<8x1x8xf32> to vector<8x8xf32>
    %22 = arith.addf %19, %21 : vector<8x8xf32>
    %23 = vector.extract_strided_slice %4 {offsets = [0, 5, 0], sizes = [8, 1, 8], strides = [1, 1, 1]} : vector<8x16x8xf32> to vector<8x1x8xf32>
    %24 = vector.shape_cast %23 : vector<8x1x8xf32> to vector<8x8xf32>
    %25 = arith.addf %22, %24 : vector<8x8xf32>
    %26 = vector.extract_strided_slice %4 {offsets = [0, 5, 0], sizes = [8, 1, 8], strides = [1, 1, 1]} : vector<8x16x8xf32> to vector<8x1x8xf32>
    %27 = vector.shape_cast %26 : vector<8x1x8xf32> to vector<8x8xf32>
    %28 = vector.extract_strided_slice %4 {offsets = [0, 6, 0], sizes = [8, 1, 8], strides = [1, 1, 1]} : vector<8x16x8xf32> to vector<8x1x8xf32>
    %29 = vector.shape_cast %28 : vector<8x1x8xf32> to vector<8x8xf32>
    %30 = arith.addf %27, %29 : vector<8x8xf32>
    %31 = vector.extract_strided_slice %4 {offsets = [0, 7, 0], sizes = [8, 1, 8], strides = [1, 1, 1]} : vector<8x16x8xf32> to vector<8x1x8xf32>
    %32 = vector.shape_cast %31 : vector<8x1x8xf32> to vector<8x8xf32>
    %33 = arith.addf %30, %32 : vector<8x8xf32>
    %34 = vector.extract_strided_slice %4 {offsets = [0, 7, 0], sizes = [8, 1, 8], strides = [1, 1, 1]} : vector<8x16x8xf32> to vector<8x1x8xf32>
    %35 = vector.shape_cast %34 : vector<8x1x8xf32> to vector<8x8xf32>
    %36 = vector.extract_strided_slice %4 {offsets = [0, 8, 0], sizes = [8, 1, 8], strides = [1, 1, 1]} : vector<8x16x8xf32> to vector<8x1x8xf32>
    %37 = vector.shape_cast %36 : vector<8x1x8xf32> to vector<8x8xf32>
    %38 = arith.addf %35, %37 : vector<8x8xf32>
    %39 = vector.extract_strided_slice %4 {offsets = [0, 9, 0], sizes = [8, 1, 8], strides = [1, 1, 1]} : vector<8x16x8xf32> to vector<8x1x8xf32>
    %40 = vector.shape_cast %39 : vector<8x1x8xf32> to vector<8x8xf32>
    %41 = arith.addf %38, %40 : vector<8x8xf32>
    %42 = vector.extract_strided_slice %4 {offsets = [0, 9, 0], sizes = [8, 1, 8], strides = [1, 1, 1]} : vector<8x16x8xf32> to vector<8x1x8xf32>
    %43 = vector.shape_cast %42 : vector<8x1x8xf32> to vector<8x8xf32>
    %44 = vector.extract_strided_slice %4 {offsets = [0, 10, 0], sizes = [8, 1, 8], strides = [1, 1, 1]} : vector<8x16x8xf32> to vector<8x1x8xf32>
    %45 = vector.shape_cast %44 : vector<8x1x8xf32> to vector<8x8xf32>
    %46 = arith.addf %43, %45 : vector<8x8xf32>
    %47 = vector.extract_strided_slice %4 {offsets = [0, 11, 0], sizes = [8, 1, 8], strides = [1, 1, 1]} : vector<8x16x8xf32> to vector<8x1x8xf32>
    %48 = vector.shape_cast %47 : vector<8x1x8xf32> to vector<8x8xf32>
    %49 = arith.addf %46, %48 : vector<8x8xf32>
    %50 = vector.extract_strided_slice %4 {offsets = [0, 11, 0], sizes = [8, 1, 8], strides = [1, 1, 1]} : vector<8x16x8xf32> to vector<8x1x8xf32>
    %51 = vector.shape_cast %50 : vector<8x1x8xf32> to vector<8x8xf32>
    %52 = vector.extract_strided_slice %4 {offsets = [0, 12, 0], sizes = [8, 1, 8], strides = [1, 1, 1]} : vector<8x16x8xf32> to vector<8x1x8xf32>
    %53 = vector.shape_cast %52 : vector<8x1x8xf32> to vector<8x8xf32>
    %54 = arith.addf %51, %53 : vector<8x8xf32>
    %55 = vector.extract_strided_slice %4 {offsets = [0, 13, 0], sizes = [8, 1, 8], strides = [1, 1, 1]} : vector<8x16x8xf32> to vector<8x1x8xf32>
    %56 = vector.shape_cast %55 : vector<8x1x8xf32> to vector<8x8xf32>
    %57 = arith.addf %54, %56 : vector<8x8xf32>
    %58 = vector.extract_strided_slice %4 {offsets = [0, 13, 0], sizes = [8, 1, 8], strides = [1, 1, 1]} : vector<8x16x8xf32> to vector<8x1x8xf32>
    %59 = vector.shape_cast %58 : vector<8x1x8xf32> to vector<8x8xf32>
    %60 = vector.extract_strided_slice %4 {offsets = [0, 14, 0], sizes = [8, 1, 8], strides = [1, 1, 1]} : vector<8x16x8xf32> to vector<8x1x8xf32>
    %61 = vector.shape_cast %60 : vector<8x1x8xf32> to vector<8x8xf32>
    %62 = arith.addf %59, %61 : vector<8x8xf32>
    %63 = vector.extract_strided_slice %4 {offsets = [0, 15, 0], sizes = [8, 1, 8], strides = [1, 1, 1]} : vector<8x16x8xf32> to vector<8x1x8xf32>
    %64 = vector.shape_cast %63 : vector<8x1x8xf32> to vector<8x8xf32>
    %65 = arith.addf %62, %64 : vector<8x8xf32>
    %66 = tpu.concatenate %9, %17, %25, %33, %41, %49, %57, %65 in 1 : vector<8x8xf32>, vector<8x8xf32>, vector<8x8xf32>, vector<8x8xf32>, vector<8x8xf32>, vector<8x8xf32>, vector<8x8xf32>, vector<8x8xf32> -> vector<8x64xf32>
    %c0_4 = arith.constant 0 : index
    %c0_5 = arith.constant 0 : index
    %67 = vector.load %arg3[%c0_4, %c0_5] : memref<8x64xf32, #tpu.memory_space<vmem>>, vector<8x64xf32>
    tpu.vector_store %arg3[%c0_4, %c0_5], %66 {strides = array<i32>} : memref<8x64xf32, #tpu.memory_space<vmem>>, vector<8x64xf32>,
    return
  }
  func.func @transform_0(%arg0: i32) -> (i32, i32) {
    %c0_i32 = arith.constant 0 : i32
    %c0_i32_0 = arith.constant 0 : i32
    %c0_i32_1 = arith.constant 0 : i32
    return %c0_i32, %c0_i32_0 : i32, i32
  }
  func.func @transform_1(%arg0: i32) -> (i32, i32, i32) {
    %c0_i32 = arith.constant 0 : i32
    %c0_i32_0 = arith.constant 0 : i32
    %c0_i32_1 = arith.constant 0 : i32
    return %arg0, %c0_i32, %c0_i32_0 : i32, i32, i32
  }
  func.func @transform_2(%arg0: i32) -> (i32, i32) {
    %c0_i32 = arith.constant 0 : i32
    %c0_i32_0 = arith.constant 0 : i32
    return %arg0, %c0_i32 : i32, i32
  }
}

</mosaic_0001>

<bundles_post_ra>
// kernel: tpu_custom_call.1
= control target key start
LH: loop header
LB: loop body
LE: loop exit
PB: predicated region body
PF: predicated region fallthrough
CT: control target
= control target key end

     0   :  { %7 = vsyncpa [#allocation3], 0  ;;  %s1343_s0 = inlined_call_operand.vmem [shape: f32[16,8], index: 0, kind: input, shape index: {}]   ;;  %s1344_s1 = inlined_call_operand.vmem [shape: f32[24,16,16], index: 1, kind: input, shape index: {}]   ;;  %s1345_s2 = inlined_call_operand.hbm [shape: f32[24,64], index: 2, kind: output, shape index: {}]  }
   0x1   :  { %9 = vsyncpa [#allocation3 + $0x1], 0  ;;  %s962_s9 = smov 0   ;;  %s964_s10 = smov 0  }
   0x2   :  { %s966_s11 = smov 0   ;;  %s968_s12 = smov 0  }
   0x3 LB: > { %s983_s13 = sadd.s32 4294967295, %s937_s12   ;;  %s748_s14 = sadd.s32 4294967294, %s937_s12   ;;  %s937_s12 = sphi %s968_s12, %s1354_s12   ;;  %s933_s11 = sphi %s966_s11, %s1353_s11   ;;  %s929_s10 = sphi %s964_s10, %s1352_s10   ;;  %s925_s9 = sphi %s962_s9, %s1351_s9  }
   0x4   : > { %s987_s15 = sadd.s32 1, %s937_s12   ;;  %s69_s16 = sadd.s32 1, %s933_s11 }
   0x5   : > { %s66_s17 = ssub.s32 %s937_s12, %s987_s15  ;;  %p79_p0 = scmp.ne.s32.totalorder %s933_s11, %s929_s10 }
   0x6   : > { %p67_p1 = scmp.eq.s32.totalorder %s66_s17, 0  ;;  %p80_p2 = scmp.eq.s32.totalorder %s983_s13, 2 }
   0x7   : > { %p85_p3 = scmp.ne.s32.totalorder %s929_s10, %s925_s9  ;;  %p86_p4 = scmp.eq.s32.totalorder %s748_s14, 2 }
   0x8   : > { %s998_s18 = scalar_select %p67_p1, %s933_s11, %s69_s16  }
   0x9   : > { %p1000_p5 = por %p80_p2, %p79_p0  ;;  %p1004_p6 = por %p86_p4, %p85_p3 }
   0xa   : > { %p751_p7 = scmp.ge.s32.totalorder %s937_s12, 1  ;;  %p117_p8 = scmp.lt.s32.totalorder %s937_s12, 4 }
   0xc   : > { %p118_p9 = pnand %p751_p7, %p117_p8 }
   0xd   : > { %v163_v0 = vld [vmem:[%s1343_s0] sm:$0xff] (!%p118_p9)  ;;  %v164_v1 = vld [vmem:[%s1343_s0 + $0x8] sm:$0xff] (!%p118_p9)  ;;  %s753_s25 = sshll.u32 (!%p118_p9), %s983_s13, 3  ;;  %vm165_vm0 = vcmask (!%p118_p9), 130048   ;;  %vm496_vm1 = vcmask (!%p118_p9), 1041409   ;;  %vm499_vm2 = vcmask (!%p118_p9), 1042434  }
   0xe   : > { %121 = sbr.rel (%p118_p9) target bundleno = 419 (0x1a3), region = 28  ;;  %v823_v2 = vpack.c.bf16 (!%p118_p9), %v164_v1, %v163_v0  ;;  %p141_p10 = scmp.lt.s32.totalorder (!%p118_p9), %s753_s25, 23  ;;  %vm502_vm3 = vcmask (!%p118_p9), 1043459   ;;  %vm505_vm4 = vcmask (!%p118_p9), 1044484   ;;  %vm508_vm5 = vcmask (!%p118_p9), 1045509  }
   0xf   : > { %vm511_vm6 = vcmask (!%p118_p9), 1046534   ;;  %vm514_vm7 = vcmask (!%p118_p9), 1047559   ;;  %s939_s30 = smov (!%p118_p9), 16   ;;  %s940_s3 = smov (!%p118_p9), 32   ;;  %vm660_vm8 = vcmask (!%p118_p9), 64512   ;;  %vm663_vm9 = vcmask (!%p118_p9), 195584  }
  0x10   : > { %824 = vmatprep.subr.bf16.mxu0 (!%p118_p9), %v823_v2  ;;  %827 = vmatprep.subr.bf16.mxu1 (!%p118_p9), %v823_v2  ;;  %s941_s4 = smov (!%p118_p9), 8   ;;  %s942_s5 = smov (!%p118_p9), 24   ;;  %vm665_vm10 = vcmask (!%p118_p9), 261120   ;;  %vm667_vm11 = vcmask (!%p118_p9), 326656   ;;  %vm669_vm12 = vcmask (!%p118_p9), 392192   ;;  %vm671_vm13 = vcmask (!%p118_p9), 457728  }
  0x11   : > { %826 = vmatpush3.bf16.msra.mxu0 (!%p118_p9), %v823_v2  ;;  %828 = vmatpush3.bf16.msra.mxu1 (!%p118_p9), %v823_v2  ;;  %s943_s6 = smov (!%p118_p9), 40   ;;  %s944_s7 = smov (!%p118_p9), 48   ;;  %vm673_vm14 = vcmask (!%p118_p9), 523264  }
  0x12   : > { %s945_s8 = smov (!%p118_p9), 56   ;;  %s137_s14 = sand.u32 (!%p118_p9), 1, %s929_s10  }
  0x13   : > { %s752_s16 = sshll.u32 (!%p118_p9), %s137_s14, 3  ;;  %s773_s17 = sshll.u32 (!%p118_p9), %s983_s13, 7 }
  0x14   : > { %s139_s21 = scalar_lea.vmem (!%p118_p9), [#allocation2], %s752_s16  ;;  %s676_s13 = scalar_lea.sflag (!%p118_p9), [#allocation3], %s137_s14 }
  0x15   : > { %s1356_s25 = smov (!%p141_p10, %s753_s25), 23  ;;  %s689_s22 = sshll.u32 %s139_s21, 4  ;;  %s1303_s22 = int_to_ptr.vmem [resolvable:$true] %s689_s22 }
  0x16   : > { %s776_s26 = sshll.u32 %s1356_s25, 4  ;;  %s1301_s25 = scalar_lea.hbm %s1345_s2, %s773_s17 }
  0x17   : > { %s145_s29 = scalar_lea.vmem %s1344_s1, %s776_s26  ;;  %s875_s26 = scalar_lea.vmem %s1303_s22, 128 }
  0x18   : > { %v147_v3 = vld [vmem:[%s145_s29] sm:$0xff]  ;;  %v148_v5 = vld [vmem:[%s145_s29 + $0x8] sm:$0xff]  ;;  %v149_v7 = vld [vmem:[%s145_s29 + $0x10] sm:$0xff]  ;;  %p876_p11 = scmp.ne.s32.totalorder %s1303_s22, %s875_s26  ;;  %s946_s27 = smov [#allocation2]  }
  0x19   : > { %v155_v4 = vld [vmem:[%s145_s29 + $0x40] sm:$0xff]  ;;  %799 = vmatprep.mubr.msk.f32.mxu0 %vm165_vm0, %v147_v3  ;;  %v156_v6 = vld [vmem:[%s145_s29 + $0x48] sm:$0xff]  ;;  %v157_v8 = vld [vmem:[%s145_s29 + $0x50] sm:$0xff]  ;;  %s879_s28 = sshll.u32 %s946_s27, 4  ;;  %s880_s28 = int_to_ptr.vmem [resolvable:$false] %s879_s28 }
  0x1a   : > { %811 = vmatprep.mubr.msk.f32.mxu1 %vm165_vm0, %v155_v4  ;;  %800 = vmatmul.mubr.msk.f32.vlgmr.msra.gmra.mrb[0].mxu0 %vm165_vm0, %v148_v5  ;;  %v150_v9 = vld [vmem:[%s145_s29 + $0x18] sm:$0xff]  ;;  %v151_v11 = vld [vmem:[%s145_s29 + $0x20] sm:$0xff]  ;;  %v152_v13 = vld [vmem:[%s145_s29 + $0x28] sm:$0xff]  ;;  %p877_p12 = pnand %p876_p11, %p1000_p5  ;;  %p882_p0 = scmp.lt.s32.totalorder %s1303_s22, %s880_s28 }
  0x1b   : > { %812 = vmatmul.mubr.msk.f32.vlgmr.msra.gmra.mrb[0].mxu1 %vm165_vm0, %v156_v6  ;;  %802 = vmatprep.mubr.msk.f32.mxu0 %vm165_vm0, %v149_v7  ;;  %v158_v10 = vld [vmem:[%s145_s29 + $0x58] sm:$0xff]  ;;  %v159_v12 = vld [vmem:[%s145_s29 + $0x60] sm:$0xff]  ;;  %v160_v14 = vld [vmem:[%s145_s29 + $0x68] sm:$0xff] }
  0x1c   : > { %814 = vmatprep.mubr.msk.f32.mxu1 %vm165_vm0, %v157_v8  ;;  %v153_v15 = vld [vmem:[%s145_s29 + $0x30] sm:$0xff]  ;;  %v154_v17 = vld [vmem:[%s145_s29 + $0x38] sm:$0xff]  ;;  %p878_p13 = pneg %p877_p12 }
  0x1d   : > { %v161_v16 = vld [vmem:[%s145_s29 + $0x70] sm:$0xff]  ;;  %v162_v18 = vld [vmem:[%s145_s29 + $0x78] sm:$0xff]  ;;  %s881_s29 = scalar_lea.vmem %s880_s28, 256 }
  0x1e   : > { %803 = vmatmul.mubr.msk.f32.gmra.mrb[2].mxu0 %vm165_vm0, %v150_v9  ;;  %p883_p1 = scmp.lt.s32.totalorder %s881_s29, %s875_s26 }
  0x1f   : > { %815 = vmatmul.mubr.msk.f32.gmra.mrb[2].mxu1 %vm165_vm0, %v158_v10  ;;  %805 = vmatprep.mubr.msk.f32.mxu0 %vm165_vm0, %v151_v11 }
  0x20   : > { %817 = vmatprep.mubr.msk.f32.mxu1 %vm165_vm0, %v159_v12  ;;  %p884_p2 = por %p883_p1, %p882_p0 }
  0x22   : > { %806 = vmatmul.mubr.msk.f32.gmra.mrb[4].mxu0 %vm165_vm0, %v152_v13  ;;  %p885_p3 = pnand %p884_p2, %p878_p13 }
  0x23   : > { %818 = vmatmul.mubr.msk.f32.gmra.mrb[4].mxu1 %vm165_vm0, %v160_v14  ;;  %808 = vmatprep.mubr.msk.f32.mxu0 %vm165_vm0, %v153_v15 }
  0x24   : > { %820 = vmatprep.mubr.msk.f32.mxu1 %vm165_vm0, %v161_v16 }
  0x26   : > { %809 = vmatmul.mubr.msk.f32.gmra.mrb[6].mxu0 %vm165_vm0, %v154_v17 }
  0x27   : > { %821 = vmatmul.mubr.msk.f32.gmra.mrb[6].mxu1 %vm165_vm0, %v162_v18 }
  0xed   : > { %v801_v19 = vpop.f32.mrb[0].mxu0 }
  0xee   : > { %v813_v20 = vpop.f32.mrb[0].mxu1  ;;  %v423_v21 = vrot.slane %v801_v19, 1  ;;  %v280_v24 = vpop.f32.mrb[1].mxu0  ;;  %v447_v26 = vrot.slane %v801_v19, 2 }
  0xef   : > { %v427_v22 = vrot.slane %v813_v20, 1  ;;  %v451_v23 = vrot.slane %v813_v20, 2  ;;  %v320_v25 = vpop.f32.mrb[1].mxu1  ;;  %v367_v27 = vrot.slane %v280_v24, 1  ;;  %v391_v35 = vrot.slane %v280_v24, 2 }
  0xf0   : > { %v371_v28 = vrot.slane %v320_v25, 1  ;;  %v395_v29 = vrot.slane %v320_v25, 2  ;;  %v471_v30 = vadd.f32 %v801_v19, %v423_v21  ;;  %v439_v32 = vadd.f32 %v423_v21, %v280_v24 }
  0xf1   : > { %v475_v31 = vadd.f32 %v813_v20, %v427_v22  ;;  %v443_v33 = vadd.f32 %v427_v22, %v320_v25  ;;  %v1036_v34 = vadd.f32 %v367_v27, %v280_v24  ;;  %v804_v37 = vpop.f32.mrb[2].mxu0 }
  0xf2   : > { %v1038_v36 = vadd.f32 %v371_v28, %v320_v25  ;;  %v816_v38 = vpop.f32.mrb[2].mxu1  ;;  %v1040_v39 = vadd.f32 %v471_v30, %v447_v26  ;;  %v1044_v41 = vadd.f32 %v447_v26, %v439_v32  ;;  %v290_v43 = vpop.f32.mrb[3].mxu0  ;;  %v424_v47 = vrot.slane %v804_v37, 1 }
  0xf3   : > { %v1042_v40 = vadd.f32 %v475_v31, %v451_v23  ;;  %v1046_v42 = vadd.f32 %v451_v23, %v443_v33  ;;  %v330_v44 = vpop.f32.mrb[3].mxu1  ;;  %v1049_v45 = vadd.f32 %v391_v35, %v1036_v34  ;;  %v448_v0 = vrot.slane %v804_v37, 2 }
  0xf4   : > { %v1052_v46 = vadd.f32 %v395_v29, %v1038_v36  ;;  %v609_v48 = vrot.slane %v1040_v39, 1  ;;  %v626_v49 = vrot.slane %v1040_v39, 3  ;;  %v643_v51 = vrot.slane %v1040_v39, 5 }
  0xf5   : > { %v615_v52 = vrot.slane %v1042_v40, 5  ;;  %v632_v53 = vrot.slane %v1042_v40, 7  ;;  %v1061_v55 = vpop.f32.mrb[4].mxu0  ;;  %v525_v57 = vrot.slane %v1049_v45, 1  ;;  %v542_v58 = vrot.slane %v1049_v45, 3 }
  0xf6   : > { %v1063_v56 = vpop.f32.mrb[4].mxu1  ;;  %v559_v59 = vrot.slane %v1049_v45, 5  ;;  %v584_v60 = vrot.slane %v1044_v41, 7  ;;  %v1069_v61 = vpop.f32.mrb[5].mxu0  ;;  %v531_v63 = vrot.slane %v1052_v46, 5  ;;  %v472_v1 = vadd.f32 %v804_v37, %v424_v47 }
  0xf7   : > { %v1071_v62 = vpop.f32.mrb[5].mxu1  ;;  %v428_v2 = vrot.slane %v816_v38, 1  ;;  %v566_v3 = vrot.slane %v1052_v46, 1  ;;  %v452_v4 = vrot.slane %v816_v38, 2  ;;  %v368_v5 = vrot.slane %v290_v43, 1 }
  0xf8   : > { %v440_v6 = vadd.f32 %v424_v47, %v290_v43  ;;  %v1075_v7 = vadd.f32 %v472_v1, %v448_v0  ;;  %v392_v9 = vrot.slane %v290_v43, 2  ;;  %v372_v10 = vrot.slane %v330_v44, 1 }
  0xf9   : > { %v476_v8 = vadd.f32 %v816_v38, %v428_v2  ;;  %v1077_v11 = vpop.f32.mrb[6].mxu0  ;;  %v384_v13 = vadd.f32 %v368_v5, %v290_v43  ;;  %v396_v15 = vrot.slane %v330_v44, 2  ;;  %v444_v16 = vadd.f32 %v428_v2, %v330_v44 }
  0xfa   : > { %v1079_v12 = vpop.f32.mrb[6].mxu1  ;;  %v464_v14 = vadd.f32 %v448_v0, %v440_v6  ;;  %v1081_v17 = vpop.f32.mrb[7].mxu0  ;;  %v1087_v19 = vsel %vm496_vm1, %v1075_v7, %v609_v48  ;;  %v644_v20 = vrot.slane %v1075_v7, 4  ;;  %v425_v22 = vrot.slane %v1061_v55, 1 }
  0xfb   : > { %v1083_v18 = vpop.f32.mrb[7].mxu1  ;;  %v1090_v21 = vadd.f32 %v476_v8, %v452_v4  ;;  %v1093_v23 = vadd.f32 %v392_v9, %v384_v13  ;;  %v495_v24 = vrot.slane %v384_v13, 7  ;;  %v1095_v26 = vadd.f32 %v372_v10, %v330_v44 }
  0xfc   : > { %v585_v25 = vrot.slane %v464_v14, 6  ;;  %v591_v27 = vrot.slane %v1046_v42, 3  ;;  %v627_v28 = vrot.slane %v1075_v7, 2  ;;  %v1100_v29 = vsel %vm496_vm1, %v644_v20, %v643_v51 }
  0xfd   : > { %v1102_v30 = vadd.f32 %v452_v4, %v444_v16  ;;  %v617_v31 = vrot.slane %v1090_v21, 4  ;;  %v634_v32 = vrot.slane %v1090_v21, 6  ;;  %v497_v33 = vsel %vm496_vm1, %v495_v24, %v1036_v34 }
  0xfe   : > { %v1110_v35 = vsel %vm496_vm1, %v1093_v23, %v525_v57  ;;  %v543_v37 = vrot.slane %v1093_v23, 2  ;;  %v560_v38 = vrot.slane %v1093_v23, 4  ;;  %v1115_v41 = vsel %vm496_vm1, %v585_v25, %v584_v60 }
  0xff   : > { %v1118_v43 = vadd.f32 %v396_v15, %v1095_v26  ;;  %v449_v44 = vrot.slane %v1061_v55, 2  ;;  %v473_v47 = vadd.f32 %v1061_v55, %v425_v22  ;;  %v429_v34 = vrot.slane %v1063_v56, 1 }
 0x100   : > { %v453_v48 = vrot.slane %v1063_v56, 2  ;;  %v369_v51 = vrot.slane %v1069_v61, 1  ;;  %v393_v57 = vrot.slane %v1069_v61, 2  ;;  %v441_v0 = vadd.f32 %v425_v22, %v1069_v61 }
 0x101   : > { %v373_v60 = vrot.slane %v1071_v62, 1  ;;  %v1128_v1 = vadd.f32 %v473_v47, %v449_v44  ;;  %v477_v2 = vadd.f32 %v1063_v56, %v429_v34  ;;  %v397_v4 = vrot.slane %v1071_v62, 2 }
 0x102   : > { %v445_v55 = vadd.f32 %v429_v34, %v1071_v62  ;;  %v385_v5 = vadd.f32 %v369_v51, %v1069_v61  ;;  %v465_v6 = vadd.f32 %v449_v44, %v441_v0  ;;  %v426_v8 = vrot.slane %v1077_v11, 1 }
 0x103   : > { %v1135_v7 = vadd.f32 %v373_v60, %v1071_v62  ;;  %v593_v10 = vrot.slane %v1102_v30, 2  ;;  %v611_v13 = vrot.slane %v1128_v1, 7  ;;  %v629_v14 = vrot.slane %v1128_v1, 1 }
 0x104   : > { %v646_v15 = vrot.slane %v1128_v1, 3  ;;  %v1145_v16 = vadd.f32 %v477_v2, %v453_v48  ;;  %v1147_v61 = vadd.f32 %v393_v57, %v385_v5  ;;  %v498_v62 = vrot.slane %v385_v5, 6 }
 0x105   : > { %v587_v20 = vrot.slane %v465_v6, 5  ;;  %v450_v22 = vrot.slane %v1077_v11, 2  ;;  %v474_v24 = vadd.f32 %v1077_v11, %v426_v8  ;;  %v628_v25 = vsel %vm496_vm1, %v627_v28, %v626_v49 }
 0x106   : > { %v527_v44 = vrot.slane %v1147_v61, 7  ;;  %v545_v47 = vrot.slane %v1147_v61, 1  ;;  %v1157_v34 = vadd.f32 %v397_v4, %v1135_v7  ;;  %v630_v51 = vsel %vm499_vm2, %v629_v14, %v628_v25 }
 0x107   : > { %v1160_v57 = vadd.f32 %v474_v24, %v450_v22  ;;  %v430_v0 = vrot.slane %v1079_v12, 1  ;;  %v454_v11 = vrot.slane %v1079_v12, 2  ;;  %v370_v39 = vrot.slane %v1081_v17, 1 }
 0x108   : > { %v562_v49 = vrot.slane %v1147_v61, 3  ;;  %v442_v28 = vadd.f32 %v426_v8, %v1081_v17  ;;  %v500_v60 = vsel %vm499_vm2, %v498_v62, %v497_v33  ;;  %v374_v2 = vrot.slane %v1083_v18, 1 }
 0x109   : > { %v613_v4 = vrot.slane %v1160_v57, 6  ;;  %v1172_v5 = vsel %vm502_vm3, %v1160_v57, %v630_v51  ;;  %v478_v6 = vadd.f32 %v1079_v12, %v430_v0  ;;  %v394_v14 = vrot.slane %v1081_v17, 2 }
 0x10a   : > { %v386_v24 = vadd.f32 %v370_v39, %v1081_v17  ;;  %v466_v25 = vadd.f32 %v450_v22, %v442_v28  ;;  %v1178_v61 = vadd.f32 %v374_v2, %v1083_v18  ;;  %v398_v33 = vrot.slane %v1083_v18, 2 }
 0x10b   : > { %v648_v8 = vrot.slane %v1160_v57, 2  ;;  %v1182_v62 = vadd.f32 %v478_v6, %v454_v11  ;;  %v446_v9 = vadd.f32 %v430_v0, %v1083_v18  ;;  %v544_v12 = vsel %vm496_vm1, %v543_v37, %v542_v58 }
 0x10c   : > { %v410_v51 = vadd.f32 %v394_v14, %v386_v24  ;;  %v501_v50 = vrot.slane %v386_v24, 5  ;;  %v414_v17 = vadd.f32 %v398_v33, %v1178_v61  ;;  %v548_v22 = vrot.slane %v1052_v46, 7 }
 0x10d   : > { %v589_v39 = vrot.slane %v466_v25, 4  ;;  %v546_v28 = vsel %vm499_vm2, %v545_v47, %v544_v12  ;;  %v550_v2 = vrot.slane %v1118_v43, 6  ;;  %v552_v6 = vrot.slane %v1157_v34, 5 }
 0x10e   : > { %v1194_v54 = vsel %vm502_vm3, %v501_v50, %v500_v60  ;;  %v529_v18 = vrot.slane %v410_v51, 6  ;;  %v564_v0 = vrot.slane %v410_v51, 2  ;;  %v547_v58 = vsel %vm502_vm3, %v410_v51, %v546_v28 }
 0x10f   : > { %v549_v37 = vsel %vm505_vm4, %v548_v22, %v547_v58  ;;  %v554_v14 = vrot.slane %v414_v17, 4  ;;  %v469_v24 = vadd.f32 %v453_v48, %v445_v55  ;;  %v470_v25 = vadd.f32 %v454_v11, %v446_v9 }
 0x110   : > { %v551_v47 = vsel %vm508_vm5, %v550_v2, %v549_v37  ;;  %v588_v33 = vsel %vm499_vm2, %v587_v20, %v1115_v41  ;;  %v528_v50 = vsel %vm499_vm2, %v527_v44, %v1110_v35  ;;  %v533_v60 = vrot.slane %v1118_v43, 4 }
 0x111   : > { %v553_v12 = vsel %vm511_vm6, %v552_v6, %v551_v47  ;;  %v590_v51 = vsel %vm502_vm3, %v589_v39, %v588_v33  ;;  %v595_v22 = vrot.slane %v469_v24, 1  ;;  %v530_v28 = vsel %vm502_vm3, %v529_v18, %v528_v50 }
 0x112   : > { %v555_v56 = vsel %vm514_vm7, %v554_v14, %v553_v12  ;;  %v592_v48 = vsel %vm505_vm4, %v591_v27, %v590_v51  ;;  %v532_v41 = vsel %vm505_vm4, %v531_v63, %v530_v28  ;;  %v535_v35 = vrot.slane %v1157_v34, 3 }
 0x113   : > { %556 = vrot.lane.b32.xlu0 %v555_v56, %s939_s30  ;;  %v594_v55 = vsel %vm508_vm5, %v593_v10, %v592_v48  ;;  %v534_v9 = vsel %vm508_vm5, %v533_v60, %v532_v41  ;;  %v537_v20 = vrot.slane %v414_v17, 2  ;;  %v561_v42 = vsel %vm496_vm1, %v560_v38, %v559_v59 }
 0x114   : > { %v596_v27 = vsel %vm511_vm6, %v595_v22, %v594_v55  ;;  %v536_v63 = vsel %vm511_vm6, %v535_v35, %v534_v9  ;;  %v563_v44 = vsel %vm499_vm2, %v562_v49, %v561_v42  ;;  %v569_v11 = vrot.slane %v1157_v34, 7 }
 0x115   : > { %v597_v30 = vsel %vm514_vm7, %v470_v25, %v596_v27  ;;  %v538_v10 = vsel %vm514_vm7, %v537_v20, %v536_v63  ;;  %v565_v39 = vsel %vm502_vm3, %v564_v0, %v563_v44  ;;  %v571_v2 = vrot.slane %v414_v17, 6 }
 0x116   : > { %598 = vrot.lane.b32.xlu1 %v597_v30, %s940_s3  ;;  %v567_v45 = vsel %vm505_vm4, %v566_v3, %v565_v39  ;;  %v612_v59 = vsel %vm499_vm2, %v611_v13, %v1087_v19  ;;  %v619_v23 = vrot.slane %v1145_v16, 3  ;;  %v621_v38 = vrot.slane %v1182_v62, 2 }
 0x117   : > { %539 = vrot.lane.b32.xlu0 %v538_v10, %s941_s4  ;;  %v568_v34 = vsel %vm508_vm5, %v1118_v43, %v567_v45  ;;  %v614_v46 = vsel %vm502_vm3, %v613_v4, %v612_v59  ;;  %v633_v3 = vsel %vm505_vm4, %v632_v53, %v1172_v5  ;;  %v636_v19 = vrot.slane %v1145_v16, 5 }
 0x118   : > { %v570_v13 = vsel %vm511_vm6, %v569_v11, %v568_v34  ;;  %v616_v49 = vsel %vm505_vm4, %v615_v52, %v614_v46  ;;  %v635_v43 = vsel %vm508_vm5, %v634_v32, %v633_v3  ;;  %v638_v17 = vrot.slane %v1182_v62, 4 }
 0x119   : > { %v572_v4 = vsel %vm514_vm7, %v571_v2, %v570_v13  ;;  %v618_v53 = vsel %vm508_vm5, %v617_v31, %v616_v49  ;;  %v637_v5 = vsel %vm511_vm6, %v636_v19, %v635_v43  ;;  %v647_v6 = vsel %vm499_vm2, %v646_v15, %v1100_v29 }
 0x11a   : > { %v510_v52 = vrot.slane %v1135_v7, 2  ;;  %573 = vrot.lane.b32.xlu1 %v572_v4, %s942_s5  ;;  %v620_v32 = vsel %vm511_vm6, %v619_v23, %v618_v53  ;;  %v639_v18 = vsel %vm514_vm7, %v638_v17, %v637_v5  ;;  %v649_v0 = vsel %vm502_vm3, %v648_v8, %v647_v6 }
 0x11b   : > { %v622_v31 = vsel %vm514_vm7, %v621_v38, %v620_v32  ;;  %v1348_v58 = vrot.slane %v1042_v40, 1  ;;  %v653_v29 = vrot.slane %v1145_v16, 7  ;;  %v1349_v7 = vrot.slane %v1038_v36, 4 }
 0x11c   : > { %v513_v37 = vrot.slane %v1178_v61, 1  ;;  %623 = vrot.lane.b32.xlu0 %v622_v31, %s943_s6  ;;  %v655_v8 = vrot.slane %v1182_v62, 6  ;;  %v1350_v40 = vrot.slane %v1095_v26, 3 }
 0x11d   : > { %v651_v1 = vsel %vm505_vm4, %v1348_v58, %v649_v0  ;;  %v506_v15 = vsel %vm505_vm4, %v1349_v7, %v1194_v54 }
 0x11e   : > { %v652_v57 = vsel %vm508_vm5, %v1090_v21, %v651_v1  ;;  %v509_v14 = vsel %vm508_vm5, %v1350_v40, %v506_v15  ;;  %640 = vrot.lane.b32.xlu1 %v639_v18, %s944_s7 }
 0x11f   : > { %v654_v16 = vsel %vm511_vm6, %v653_v29, %v652_v57  ;;  %v512_v36 = vsel %vm511_vm6, %v510_v52, %v509_v14 }
 0x120   : > { %v656_v54 = vsel %vm514_vm7, %v655_v8, %v654_v16  ;;  %v515_v61 = vsel %vm514_vm7, %v513_v37, %v512_v36 }
 0x121   : > { %657 = vrot.lane.b32.xlu0 %v656_v54, %s945_s8 }
 0x185   : > { %v557_v24 = vpop.permute.xlu0 %556 }
 0x188   : > { %v599_v21 = vpop.permute.xlu1 %598 }
 0x189   : > { %v540_v26 = vpop.permute.xlu0 %539 }
 0x18a   : > { %v661_v62 = vsel %vm660_vm8, %v515_v61, %v540_v26 }
 0x18b   : > { %v662_v25 = vsel %vm165_vm0, %v661_v62, %v557_v24 }
 0x18c   : > { %v574_v47 = vpop.permute.xlu1 %573 }
 0x18d   : > { %v664_v33 = vsel %vm663_vm9, %v662_v25, %v574_v47 }
 0x18e   : > { %v666_v50 = vsel %vm665_vm10, %v664_v33, %v599_v21  ;;  %v624_v60 = vpop.permute.xlu0 %623 }
 0x18f   : > { %v668_v12 = vsel %vm667_vm11, %v666_v50, %v624_v60 }
 0x190   : > { %v641_v51 = vpop.permute.xlu1 %640 }
 0x191   : > { %v670_v22 = vsel %vm669_vm12, %v668_v12, %v641_v51 }
 0x193   : > { %v658_v28 = vpop.permute.xlu0 %657 }
 0x194   : > { %v672_v56 = vsel %vm671_vm13, %v670_v22, %v658_v28 }
 0x195   : > { %674 = vst.msk [vmem:[%s139_s21] sm:$0xff] %vm673_vm14, %v672_v56 }
 0x196   : > { %888 = shalt.err (!%p885_p3)
}
 0x197   : > { %s889_s30 = scalar_lea.hbm %s1301_s25, 128  ;;  %s893_s5 = scalar_lea.hbm %s1345_s2, 384 }
 0x198   : > { %p890_p4 = scmp.ne.s32.totalorder %s1301_s25, %s889_s30  ;;  %p894_p9 = scmp.lt.u32.totalorder %s1301_s25, %s1345_s2 }
 0x199   : > { %p895_p10 = scmp.lt.u32.totalorder %s893_s5, %s889_s30  ;;  %p897_p12 = scmp.lt.u32.totalorder %s889_s30, %s1301_s25 }
 0x19a   : > { %p891_p7 = pnand %p890_p4, %p1000_p5 }
 0x19b   : > { %p896_p11 = por %p895_p10, %p894_p9 }
 0x19c   : > { %p892_p8 = pneg %p891_p7 }
 0x19d   : > { %p898_p13 = por %p897_p12, %p896_p11 }
 0x19f   : > { %p899_p0 = pnand %p898_p13, %p892_p8 }
 0x1a1   : > { %902 = shalt.err (!%p899_p0)
}
 0x1a2   : > { %829 = dma.vmem_to_hbm [thread:$0]  (%p1000_p5), %s1303_s22, 128, %s1301_s25, %s676_s13  }
 0x1a3 PF: > { %p835_p1 = scmp.ge.s32.totalorder %s937_s12, 2  ;;  %s701_s8 = sand.u32 1, %s925_s9  }
 0x1a4   : > { %s702_s14 = scalar_lea.sflag [#allocation3], %s701_s8 }
 0x1a5   : > { %p832_p2 = pnand %p835_p1, %p1004_p6 }
 0x1a7   : > { %920 = dma.done.wait (!%p832_p2), %s702_s14, 128  }
 0x1a8   : > { %922 = vsyncadd (!%p832_p2), %s702_s14, 4294967168  ;;  %p12_p3 = scmp.ge.s32.totalorder %s987_s15, 5   ;;  %s1351_s9 = smov %s929_s10 }
 0x1a9   : > { %s1352_s10 = smov %s933_s11  ;;  %s1353_s11 = smov %s998_s18 }
 0x1aa   : > { %s1354_s12 = smov %s987_s15  ;;  %14 = sbr.rel (!%p12_p3) target bundleno = 3 (0x3), region = 63 }
 0x1b1   :  { %707 = vsyncpa [#allocation3], 1 }
 0x1b2   :  { %709 = vsyncpa [#allocation3 + $0x1], 1 }

</bundles_post_ra>
